<compile_context>
chip_gen: v6e
topology: v6e:2x2x1
jax: 0.10.0
libtpu: 0.0.40
codegen_flags: <defaults>
</compile_context>

<pallas_src>
import math

import numpy as np
import jax
import jax.numpy as jnp
from jax import lax
from jax.experimental import pallas as pl
from jax.experimental.pallas import tpu as pltpu

# Model hyperparameters (small, consistent with the module's constraints).
N_EMBD = 32
N_HEAD = 4
HEAD_DIM = N_EMBD // N_HEAD
B = 2
T = 8
R = B * T  # flattened (batch*time) rows handled per call


def _build_constants():
    """Host-side numpy constants shipped to the kernel as tiny VMEM inputs."""
    r = np.arange(R)
    c = np.arange(N_HEAD * R)
    # Additive block-causal bias over the lane-stacked (R, H*R) score slab:
    # row r may attend to column (head h, key c%R) iff same batch element
    # (r // T == (c%R) // T) and (c%R) <= r.  0 where allowed, -1e30 otherwise.
    cr = c % R
    allowed = ((r[:, None] // T) == (cr[None, :] // T)) & (cr[None, :] <= r[:, None])
    causal_bias = np.where(allowed, 0.0, -1e30).astype(np.float32)          # (R, H*R)

    # Head selector for the sublane-tiled K / V slabs: sublane block h keeps
    # only the 8 lanes belonging to head h.
    i = np.arange(N_HEAD * R)[:, None]
    j = np.arange(N_EMBD)[None, :]
    head_mask = ((i // R) == (j // HEAD_DIM)).astype(np.float32)            # (H*R, C)

    # Block-diagonal ones: one MXU matmul computes the per-head-segment row
    # sums of exp(scores), already broadcast across each segment.
    a = np.arange(N_HEAD * R)
    seg_ones = ((a[:, None] // R) == (a[None, :] // R)).astype(np.float32)  # (H*R, H*R)

    return jnp.asarray(causal_bias), jnp.asarray(head_mask), jnp.asarray(seg_ones)


_CAUSAL_BIAS, _HEAD_MASK, _SEG_ONES = _build_constants()


def _causal_attn_kernel(x_ref, wqkv_ref, bqkv_ref, wproj_ref, bproj_ref,
                        bias_ref, hmask_ref, segones_ref, o_ref):
    """Single grid-less invocation: x_ref (R, C) -> o_ref (R, C)."""
    C = N_EMBD
    scale = jnp.float32(1.0 / math.sqrt(HEAD_DIM))

    x = x_ref[...]                                                 # (R, C) f32

    # --- QKV projection: one (R, C) @ (C, 3C) MXU matmul ---
    qkv = jnp.dot(x, wqkv_ref[...], preferred_element_type=jnp.float32)
    qkv = qkv + bqkv_ref[...]                                      # (R, 3C)
    q = qkv[:, 0 * C:1 * C] * scale                                # scale folded into q once
    k = qkv[:, 1 * C:2 * C]
    v = qkv[:, 2 * C:3 * C]

    # --- Lane-stack the heads ---
    # Tile K/V H times along sublanes and zero the lanes not owned by each
    # copy's head (sublane concat of identical tiles: cheap copies, no XLU
    # lane shuffles).
    hmask = hmask_ref[...]                                         # (H*R, C)
    k_stk = jnp.concatenate([k] * N_HEAD, axis=0) * hmask          # (H*R, C)
    v_stk = jnp.concatenate([v] * N_HEAD, axis=0) * hmask          # (H*R, C)

    # All-head scores in ONE matmul (contract last dims -> no transpose):
    #   s[r, h*R + c] = <q[r, head-h lanes], k[c, head-h lanes]> / sqrt(hd)
    s = lax.dot_general(q, k_stk, (((1,), (1,)), ((), ())),
                        preferred_element_type=jnp.float32)        # (R, H*R)
    s = s + bias_ref[...]                                          # block-causal bias: single add

    # One 64-lane row-max for the whole slab.  Subtracting a per-row constant
    # is exact for every head segment's softmax; masked entries (-1e30)
    # underflow to exactly 0 in exp.
    s = s - jnp.max(s, axis=-1, keepdims=True)
    p = jnp.exp(s)                                                 # EUP at 64-lane occupancy

    # Per-head-segment row sums (broadcast within each segment) via one
    # constant block-diagonal ones matmul -- replaces 4 XLU reduce+broadcasts.
    seg = jnp.dot(p, segones_ref[...], preferred_element_type=jnp.float32)   # (R, H*R)
    pn = p * pl.reciprocal(seg, approx=False)                      # exact: keeps 1e-4 tolerance

    # Head outputs land directly interleaved as (R, C); then one output
    # projection with the bias folded into the final add.
    y = jnp.dot(pn, v_stk, preferred_element_type=jnp.float32)     # (R, C)
    out = bproj_ref[...] + jnp.dot(y, wproj_ref[...],
                                   preferred_element_type=jnp.float32)
    o_ref[...] = out.astype(o_ref.dtype)


def causal_self_attention(x, w_qkv, b_qkv, w_proj, b_proj):
    """x: (B, T, C) float32. Returns (B, T, C) float32."""
    Bsz, Tlen, C = x.shape
    assert Bsz == B and Tlen == T and C == N_EMBD

    xf = x.reshape(Bsz * Tlen, C)                                  # free XLA-level reshape
    vmem = pltpu.MemorySpace.VMEM
    out = pl.pallas_call(
        _causal_attn_kernel,
        out_shape=jax.ShapeDtypeStruct((Bsz * Tlen, C), x.dtype),
        in_specs=[pl.BlockSpec(memory_space=vmem)] * 8,
        out_specs=pl.BlockSpec(memory_space=vmem),
    )(xf, w_qkv, b_qkv, w_proj, b_proj, _CAUSAL_BIAS, _HEAD_MASK, _SEG_ONES)
    return out.reshape(Bsz, Tlen, C)


def reference(x, w_qkv, b_qkv, w_proj, b_proj):
    """Pure-JAX reference mirroring the PyTorch forward."""
    Bsz, Tlen, C = x.shape
    qkv = x @ w_qkv + b_qkv[0]
    q, k, v = jnp.split(qkv, 3, axis=-1)

    def to_heads(t):  # (B, T, C) -> (B, H, T, hd)
        return t.reshape(Bsz, Tlen, N_HEAD, HEAD_DIM).transpose(0, 2, 1, 3)

    q, k, v = to_heads(q), to_heads(k), to_heads(v)
    scores = jnp.einsum("bhqd,bhkd->bhqk", q, k) / math.sqrt(HEAD_DIM)
    mask = jnp.tril(jnp.ones((Tlen, Tlen), dtype=bool))
    scores = jnp.where(mask, scores, -jnp.inf)
    p = jax.nn.softmax(scores, axis=-1)
    y = jnp.einsum("bhqk,bhkd->bhqd", p, v)
    y = y.transpose(0, 2, 1, 3).reshape(Bsz, Tlen, C)
    return y @ w_proj + b_proj[0]


if __name__ == "__main__":
    key = jax.random.PRNGKey(0)
    kx, k1, k2, k3, k4 = jax.random.split(key, 5)

    x = jax.random.normal(kx, (B, T, N_EMBD), dtype=jnp.float32)

    # Deterministic synthetic parameters (shapes implied by the nn.Linear layers,
    # stored (in, out) so the kernel computes x @ W + b).
    w_qkv = jax.random.normal(k1, (N_EMBD, 3 * N_EMBD), dtype=jnp.float32) * 0.02
    b_qkv = jax.random.normal(k2, (1, 3 * N_EMBD), dtype=jnp.float32) * 0.02
    w_proj = jax.random.normal(k3, (N_EMBD, N_EMBD), dtype=jnp.float32) * 0.02
    b_proj = jax.random.normal(k4, (1, N_EMBD), dtype=jnp.float32) * 0.02

    out = causal_self_attention(x, w_qkv, b_qkv, w_proj, b_proj)
    out = jax.block_until_ready(out)

    ref = reference(x, w_qkv, b_qkv, w_proj, b_proj)
    assert out.shape == (B, T, N_EMBD)
    assert jnp.allclose(out, ref, atol=1e-4, rtol=1e-4), "mismatch vs reference"

    print("KERNEL_OK")
</pallas_src>

<mosaic_0001>
module attributes {stable_mosaic.version = 11 : i64} {
  func.func @_causal_attn_kernel(%arg0: memref<16x32xf32, #tpu.memory_space<vmem>>, %arg1: memref<32x96xf32, #tpu.memory_space<vmem>>, %arg2: memref<1x96xf32, #tpu.memory_space<vmem>>, %arg3: memref<32x32xf32, #tpu.memory_space<vmem>>, %arg4: memref<1x32xf32, #tpu.memory_space<vmem>>, %arg5: memref<16x64xf32, #tpu.memory_space<vmem>>, %arg6: memref<64x32xf32, #tpu.memory_space<vmem>>, %arg7: memref<64x64xf32, #tpu.memory_space<vmem>>, %arg8: memref<16x32xf32, #tpu.memory_space<vmem>>) attributes {dimension_semantics = [], scalar_prefetch = 0 : i64, scratch_operands = 0 : i64, tpu.core_type = #tpu.core_type<tc>} {
    %c0 = arith.constant 0 : index
    %c0_0 = arith.constant 0 : index
    %0 = vector.load %arg0[%c0, %c0_0] : memref<16x32xf32, #tpu.memory_space<vmem>>, vector<16x32xf32>
    %c0_1 = arith.constant 0 : index
    %c0_2 = arith.constant 0 : index
    %1 = vector.load %arg1[%c0_1, %c0_2] : memref<32x96xf32, #tpu.memory_space<vmem>>, vector<32x96xf32>
    %cst = arith.constant dense<0.000000e+00> : vector<16x96xf32>
    %2 = tpu.matmul %0, %1, %cst {dimension_numbers = #tpu.dot_dimension_numbers<[1], [0], [0], [1], [0, 0, 1, 1], [], []>} : vector<16x32xf32>, vector<32x96xf32>, vector<16x96xf32> -> vector<16x96xf32>
    %c0_3 = arith.constant 0 : index
    %c0_4 = arith.constant 0 : index
    %3 = vector.load %arg2[%c0_3, %c0_4] : memref<1x96xf32, #tpu.memory_space<vmem>>, vector<1x96xf32>
    %4 = vector.broadcast %3 : vector<1x96xf32> to vector<16x96xf32>
    %5 = arith.addf %2, %4 : vector<16x96xf32>
    %6 = vector.extract_strided_slice %5 {offsets = [0, 0], sizes = [16, 32], strides = [1, 1]} : vector<16x96xf32> to vector<16x32xf32>
    %cst_5 = arith.constant 0.353553385 : f32
    %7 = vector.broadcast %cst_5 : f32 to vector<16x32xf32>
    %8 = arith.mulf %6, %7 : vector<16x32xf32>
    %9 = vector.extract_strided_slice %5 {offsets = [0, 32], sizes = [16, 32], strides = [1, 1]} : vector<16x96xf32> to vector<16x32xf32>
    %10 = vector.extract_strided_slice %5 {offsets = [0, 64], sizes = [16, 32], strides = [1, 1]} : vector<16x96xf32> to vector<16x32xf32>
    %c0_6 = arith.constant 0 : index
    %c0_7 = arith.constant 0 : index
    %11 = vector.load %arg6[%c0_6, %c0_7] : memref<64x32xf32, #tpu.memory_space<vmem>>, vector<64x32xf32>
    %12 = tpu.concatenate %9, %9, %9, %9 in 0 : vector<16x32xf32>, vector<16x32xf32>, vector<16x32xf32>, vector<16x32xf32> -> vector<64x32xf32>
    %13 = arith.mulf %12, %11 : vector<64x32xf32>
    %14 = tpu.concatenate %10, %10, %10, %10 in 0 : vector<16x32xf32>, vector<16x32xf32>, vector<16x32xf32>, vector<16x32xf32> -> vector<64x32xf32>
    %15 = arith.mulf %14, %11 : vector<64x32xf32>
    %cst_8 = arith.constant dense<0.000000e+00> : vector<16x64xf32>
    %16 = tpu.matmul %8, %13, %cst_8 {dimension_numbers = #tpu.dot_dimension_numbers<[1], [1], [0], [0], [0, 0, 1, 0], [], []>} : vector<16x32xf32>, vector<64x32xf32>, vector<16x64xf32> -> vector<16x64xf32>
    %c0_9 = arith.constant 0 : index
    %c0_10 = arith.constant 0 : index
    %17 = vector.load %arg5[%c0_9, %c0_10] : memref<16x64xf32, #tpu.memory_space<vmem>>, vector<16x64xf32>
    %18 = arith.addf %16, %17 : vector<16x64xf32>
    %cst_11 = arith.constant dense<0xFF800000> : vector<16xf32>
    %19 = vector.multi_reduction <maximumf>, %18, %cst_11 [1] : vector<16x64xf32> to vector<16xf32>
    %20 = vector.shape_cast %19 : vector<16xf32> to vector<16x1xf32>
    %21 = vector.broadcast %20 : vector<16x1xf32> to vector<16x64xf32>
    %22 = arith.subf %18, %21 : vector<16x64xf32>
    %23 = math.exp %22 : vector<16x64xf32>
    %c0_12 = arith.constant 0 : index
    %c0_13 = arith.constant 0 : index
    %24 = vector.load %arg7[%c0_12, %c0_13] : memref<64x64xf32, #tpu.memory_space<vmem>>, vector<64x64xf32>
    %cst_14 = arith.constant dense<0.000000e+00> : vector<16x64xf32>
    %25 = tpu.matmul %23, %24, %cst_14 {dimension_numbers = #tpu.dot_dimension_numbers<[1], [0], [0], [1], [0, 0, 1, 1], [], []>} : vector<16x64xf32>, vector<64x64xf32>, vector<16x64xf32> -> vector<16x64xf32>
    %26 = tpu.reciprocal %25 : vector<16x64xf32> -> vector<16x64xf32>
    %27 = arith.mulf %23, %26 : vector<16x64xf32>
    %cst_15 = arith.constant dense<0.000000e+00> : vector<16x32xf32>
    %28 = tpu.matmul %27, %15, %cst_15 {dimension_numbers = #tpu.dot_dimension_numbers<[1], [0], [0], [1], [0, 0, 1, 1], [], []>} : vector<16x64xf32>, vector<64x32xf32>, vector<16x32xf32> -> vector<16x32xf32>
    %c0_16 = arith.constant 0 : index
    %c0_17 = arith.constant 0 : index
    %29 = vector.load %arg4[%c0_16, %c0_17] : memref<1x32xf32, #tpu.memory_space<vmem>>, vector<1x32xf32>
    %c0_18 = arith.constant 0 : index
    %c0_19 = arith.constant 0 : index
    %30 = vector.load %arg3[%c0_18, %c0_19] : memref<32x32xf32, #tpu.memory_space<vmem>>, vector<32x32xf32>
    %cst_20 = arith.constant dense<0.000000e+00> : vector<16x32xf32>
    %31 = tpu.matmul %28, %30, %cst_20 {dimension_numbers = #tpu.dot_dimension_numbers<[1], [0], [0], [1], [0, 0, 1, 1], [], []>} : vector<16x32xf32>, vector<32x32xf32>, vector<16x32xf32> -> vector<16x32xf32>
    %32 = vector.broadcast %29 : vector<1x32xf32> to vector<16x32xf32>
    %33 = arith.addf %32, %31 : vector<16x32xf32>
    %c0_21 = arith.constant 0 : index
    %c0_22 = arith.constant 0 : index
    %34 = vector.load %arg8[%c0_21, %c0_22] : memref<16x32xf32, #tpu.memory_space<vmem>>, vector<16x32xf32>
    tpu.vector_store %arg8[%c0_21, %c0_22], %33 {strides = array<i32>} : memref<16x32xf32, #tpu.memory_space<vmem>>, vector<16x32xf32>,
    return
  }
}

</mosaic_0001>

<bundles_post_ra>
// kernel: tpu_custom_call.1
= control target key start
LH: loop header
LB: loop body
LE: loop exit
PB: predicated region body
PF: predicated region fallthrough
CT: control target
= control target key end

     0   :  { %13 = vsyncpa [#allocation3], 0  ;;  %s1192_s0 = inlined_call_operand.hbm [shape: f32[16,32], index: 0, kind: input, shape index: {}]   ;;  %s1193_s1 = inlined_call_operand.vmem [shape: f32[32,96], index: 1, kind: input, shape index: {}]   ;;  %s1194_s2 = inlined_call_operand.vmem [shape: f32[1,96], index: 2, kind: input, shape index: {}]   ;;  %s1195_s3 = inlined_call_operand.hbm [shape: f32[32,32], index: 3, kind: input, shape index: {}]   ;;  %s1196_s4 = inlined_call_operand.vmem [shape: f32[1,32], index: 4, kind: input, shape index: {}]   ;;  %s1197_s5 = inlined_call_operand.hbm [shape: f32[16,64], index: 5, kind: input, shape index: {}]   ;;  %s1198_s6 = inlined_call_operand.vmem [shape: f32[64,32], index: 6, kind: input, shape index: {}]   ;;  %s1199_s7 = inlined_call_operand.vmem [shape: f32[64,64], index: 7, kind: input, shape index: {}]   ;;  %s1200_s8 = inlined_call_operand.hbm [shape: f32[16,32], index: 8, kind: output, shape index: {}]  }
   0x1   :  { %14 = vsyncpa [#allocation6], 0 }
   0x2   :  { %15 = vsyncpa [#allocation4], 0  ;;  %s948_s27 = smov [#allocation5]   ;;  %s949_s29 = smov [#allocation2]  }
   0x3   :  { %s37_s28 = sshll.u32 %s948_s27, 4  ;;  %s21_s30 = sshll.u32 %s949_s29, 4  ;;  %s38_s28 = int_to_ptr.vmem [resolvable:$true] %s37_s28  ;;  %s22_s30 = int_to_ptr.vmem [resolvable:$true] %s21_s30 }
   0x4   :  { %s870_s9 = scalar_lea.vmem %s38_s28, 512  ;;  %p875_p1 = scmp.lt.s32.totalorder %s38_s28, %s38_s28 }
   0x5   :  { %p871_p0 = scmp.ne.s32.totalorder %s38_s28, %s870_s9  ;;  %p876_p2 = scmp.lt.s32.totalorder %s870_s9, %s870_s9 }
   0x7   :  { %p877_p3 = por %p876_p2, %p875_p1 }
   0x9   :  { %p878_p4 = pnand %p877_p3, %p871_p0 }
   0xb   :  { %881 = shalt.err (!%p878_p4)
}
   0xc   :  { %s950_s10 = smov 128   ;;  %s951_s11 = smov 8  }
   0xd   :  { %43 = dma.hbm_to_vmem [thread:$0]  %s1195_s3, 512, %s38_s28, [#allocation6], %s950_s10, %s950_s10, %s951_s11  }
   0xe   :  { %s890_s14 = scalar_lea.vmem %s22_s30, 256  ;;  %p895_p6 = scmp.lt.s32.totalorder %s22_s30, %s22_s30 }
   0xf   :  { %p891_p5 = scmp.ne.s32.totalorder %s22_s30, %s890_s14  ;;  %p896_p7 = scmp.lt.s32.totalorder %s890_s14, %s890_s14 }
  0x11   :  { %p897_p8 = por %p896_p7, %p895_p6 }
  0x13   :  { %p898_p9 = pnand %p897_p8, %p891_p5 }
  0x15   :  { %901 = shalt.err (!%p898_p9)
}
  0x16   :  { %27 = dma.hbm_to_vmem [thread:$0]  %s1192_s0, 256, %s22_s30, [#allocation3], %s950_s10, %s950_s10, %s951_s11  }
  0x17   :  { %s952_s17 = smov [#allocation7]  }
  0x18   :  { %s51_s18 = sshll.u32 %s952_s17, 4  ;;  %s52_s18 = int_to_ptr.vmem [resolvable:$true] %s51_s18 }
  0x19   :  { %s910_s19 = scalar_lea.vmem %s52_s18, 256  ;;  %p915_p11 = scmp.lt.s32.totalorder %s52_s18, %s52_s18 }
  0x1a   :  { %p911_p10 = scmp.ne.s32.totalorder %s52_s18, %s910_s19  ;;  %p916_p12 = scmp.lt.s32.totalorder %s910_s19, %s910_s19 }
  0x1c   :  { %p917_p13 = por %p916_p12, %p915_p11 }
  0x1e   :  { %p918_p0 = pnand %p917_p13, %p911_p10 }
  0x20   :  { %921 = shalt.err (!%p918_p0)
}
  0x21   :  { %57 = dma.hbm_to_vmem [thread:$0]  %s1197_s5, 256, %s52_s18, [#allocation6], %s950_s10, %s950_s10, %s951_s11  }
  0x22   :  { %942 = dma.done.wait [#allocation3], 256  }
  0x23   :  { %943 = vsyncadd [#allocation3], 4294967040 }
  0x24   :  { %944 = dma.done.wait [#allocation6], 768  }
  0x25   :  { %945 = vsyncadd [#allocation6], 4294966528  ;;  %vm84_vm0 = vcmask 261120   ;;  %v76_v0 = vld [vmem:[%s1193_s1 + $0x18] sm:$0xff]  ;;  %v75_v1 = vld [vmem:[%s1193_s1 + $0x10] sm:$0xff]  ;;  %s953_s29 = smov 32  }
  0x26   :  { %766 = vmatprep.subr.mxu0 %v76_v0  ;;  %v71_v2 = vld [vmem:[#allocation2] sm:$0xff]  ;;  %v74_v3 = vld [vmem:[%s1193_s1 + $0x8] sm:$0xff]  ;;  %v1033_v4 = vld [vmem:[%s1198_s6 + $0x38] sm:$0xff]  ;;  %vm371_vm1 = vcmask 523264   ;;  %s955_s5 = smov 64   ;;  %s956_s18 = smov [#allocation8]  }
  0x27   :  { %767 = vmatpush3.msra.mxu0 %v76_v0  ;;  %774 = vmatprep.mubr.msk.f32.mxu0 %vm84_vm0, %v71_v2  ;;  %v1038_v5 = vld [vmem:[%s1198_s6 + $0x28] sm:$0xff]  ;;  %v73_v6 = vld [vmem:[%s1193_s1] sm:$0xff]  ;;  %v1048_v7 = vld [vmem:[%s1198_s6 + $0x30] sm:$0xff]  ;;  %s691_s19 = sshll.u32 %s956_s18, 4  ;;  %s692_s19 = int_to_ptr.vmem [resolvable:$true] %s691_s19 }
  0x28   :  { %768 = vmatprep.subr.mxu0 %v75_v1  ;;  %198 = vrot.lane.b32.xlu0 %v1033_v4, %s953_s29  ;;  %v1053_v8 = vld [vmem:[%s1198_s6 + $0x20] sm:$0xff]  ;;  %v72_v9 = vld [vmem:[#allocation2 + $0x8] sm:$0xff]  ;;  %v1060_v10 = vld [vmem:[%s1198_s6 + $0x18] sm:$0xff]  ;;  %s922_s3 = scalar_lea.vmem %s692_s19, 256  ;;  %p927_p2 = scmp.lt.s32.totalorder %s692_s19, %s692_s19 }
  0x29   :  { %769 = vmatpush3.msra.mxu0 %v75_v1  ;;  %194 = vrot.lane.b32.xlu1 %v1038_v5, %s953_s29  ;;  %v1066_v11 = vld [vmem:[%s1198_s6 + $0x10] sm:$0xff]  ;;  %v1073_v12 = vld [vmem:[%s1198_s6 + $0x8] sm:$0xff]  ;;  %v1078_v13 = vld [vmem:[%s1198_s6] sm:$0xff]  ;;  %s954_s6 = smov 96   ;;  %p923_p1 = scmp.ne.s32.totalorder %s692_s19, %s922_s3 }
  0x2a   :  { %770 = vmatprep.subr.mxu0 %v74_v3  ;;  %v704_v16 = vld [vmem:[%s1194_s2] ss:$0 sm:$0xff]  ;;  %v249_v45 = vld [vmem:[#allocation7 + $0x8] sm:$0xff]  ;;  %v248_v47 = vld [vmem:[#allocation7] sm:$0xff]  ;;  %p928_p3 = scmp.lt.s32.totalorder %s922_s3, %s922_s3 }
  0x2b   :  { %771 = vmatpush3.msra.mxu0 %v74_v3  ;;  %v391_v53 = vld [vmem:[%s1199_s7 + $0x38] sm:$0xff]  ;;  %v390_v54 = vld [vmem:[%s1199_s7 + $0x30] sm:$0xff]  ;;  %v389_v55 = vld [vmem:[%s1199_s7 + $0x28] sm:$0xff] }
  0x2c   :  { %772 = vmatprep.subr.mxu0 %v73_v6  ;;  %196 = vrot.lane.b32.xlu0 %v1048_v7, %s953_s29  ;;  %v388_v56 = vld [vmem:[%s1199_s7 + $0x20] sm:$0xff]  ;;  %v387_v57 = vld [vmem:[%s1199_s7 + $0x18] sm:$0xff]  ;;  %v386_v58 = vld [vmem:[%s1199_s7 + $0x10] sm:$0xff]  ;;  %p929_p4 = por %p928_p3, %p927_p2 }
  0x2d   :  { %773 = vmatpush3.msra.mxu0 %v73_v6  ;;  %192 = vrot.lane.b32.xlu1 %v1053_v8, %s953_s29  ;;  %v385_v59 = vld [vmem:[%s1199_s7 + $0x8] sm:$0xff]  ;;  %v384_v60 = vld [vmem:[%s1199_s7] sm:$0xff] }
  0x2e   :  { %775 = vmatmul.mubr.msk.f32.vlgmr.msra.gmra.mxu0 %vm84_vm0, %v72_v9  ;;  %796 = vmatprep.subr.mxu0 %v391_v53  ;;  %p930_p5 = pnand %p929_p4, %p923_p1 }
  0x2f   :  { %797 = vmatpush3.msra.mxu0 %v391_v53 }
  0x30   :  { %190 = vrot.lane.b32.xlu0 %v1060_v10, %s953_s29  ;;  %798 = vmatprep.subr.mxu0 %v390_v54 }
  0x31   :  { %188 = vrot.lane.b32.xlu1 %v1066_v11, %s953_s29  ;;  %799 = vmatpush3.msra.mxu0 %v390_v54 }
  0x32   :  { %800 = vmatprep.subr.mxu0 %v389_v55 }
  0x33   :  { %801 = vmatpush3.msra.mxu0 %v389_v55 }
  0x34   :  { %186 = vrot.lane.b32.xlu0 %v1073_v12, %s953_s29  ;;  %802 = vmatprep.subr.mxu0 %v388_v56 }
  0x35   :  { %184 = vrot.lane.b32.xlu1 %v1078_v13, %s953_s29  ;;  %803 = vmatpush3.msra.mxu0 %v388_v56 }
  0x36   :  { %804 = vmatprep.subr.mxu0 %v387_v57 }
  0x37   :  { %805 = vmatpush3.msra.mxu0 %v387_v57 }
  0x38   :  { %806 = vmatprep.subr.mxu0 %v386_v58 }
  0x39   :  { %807 = vmatpush3.msra.mxu0 %v386_v58 }
  0x3a   :  { %808 = vmatprep.subr.mxu0 %v385_v59 }
  0x3b   :  { %809 = vmatpush3.msra.mxu0 %v385_v59 }
  0x3c   :  { %810 = vmatprep.subr.mxu0 %v384_v60 }
  0x3d   :  { %811 = vmatpush3.msra.mxu0 %v384_v60 }
  0x9a   :  { %v199_v14 = vpop.permute.xlu0 %198 }
  0x9b   :  { %v195_v15 = vpop.permute.xlu1 %194 }
  0x9e   :  { %v197_v17 = vpop.permute.xlu0 %196 }
  0x9f   :  { %v193_v20 = vpop.permute.xlu1 %192 }
  0xa2   :  { %v191_v26 = vpop.permute.xlu0 %190 }
  0xa3   :  { %v189_v28 = vpop.permute.xlu1 %188 }
  0xa6   :  { %v187_v31 = vpop.permute.xlu0 %186 }
  0xa7   :  { %v185_v33 = vpop.permute.xlu1 %184 }
  0xee   :  { %v776_v18 = vpop.f32.mrf.mxu0 }
  0xef   :  { %v1085_v19 = vadd.f32 %v776_v18, %v704_v16 }
  0xf0   :  { %v157_v21 = vpop.f32.mrf.mxu0 }
  0xf1   :  { %v1087_v22 = vadd.f32 %v704_v16, %v157_v21  ;;  %v215_v23 = vmul.f32 %v199_v14, %v1085_v19  ;;  %v213_v27 = vmul.f32 %v195_v15, %v1085_v19  ;;  %v211_v30 = vmul.f32 %v191_v26, %v1085_v19 }
  0xf2   :  { %v209_v34 = vmul.f32 %v187_v31, %v1085_v19  ;;  %v167_v44 = vmul.f32 0.35355338, %v1085_v19 }
  0xf3   :  { %272 = vrot.lane.b32.xlu0 %v215_v23, %s954_s6  ;;  %v214_v24 = vmul.f32 %v197_v17, %v1087_v22  ;;  %v166_v25 = vmul.f32 0.35355338, %v1087_v22  ;;  %v212_v29 = vmul.f32 %v193_v20, %v1087_v22  ;;  %v210_v32 = vmul.f32 %v189_v28, %v1087_v22  ;;  %v594_v23 = vld [vmem:[#allocation5 + $0x18] sm:$0xff] }
  0xf4   :  { %v208_v35 = vmul.f32 %v185_v33, %v1087_v22 }
  0xf5   :  { %270 = vrot.lane.b32.xlu1 %v214_v24, %s954_s6  ;;  %793 = vmatprep.mubr.msk.f32.mxu1 %vm84_vm0, %v166_v25  ;;  %v593_v24 = vld [vmem:[#allocation5 + $0x10] sm:$0xff] }
  0xf7   :  { %268 = vrot.lane.b32.xlu0 %v213_v27, %s954_s6 }
  0xf9   :  { %266 = vrot.lane.b32.xlu1 %v212_v29, %s954_s6 }
  0xfb   :  { %264 = vrot.lane.b32.xlu0 %v211_v30, %s954_s6 }
  0xfd   :  { %262 = vrot.lane.b32.xlu1 %v210_v32, %s954_s6 }
  0xff   :  { %260 = vrot.lane.b32.xlu0 %v209_v34, %s954_s6 }
 0x101   :  { %258 = vrot.lane.b32.xlu1 %v208_v35, %s954_s6 }
 0x165   :  { %v273_v36 = vpop.permute.xlu0 %272 }
 0x166   :  { %777 = vmatprep.subr.msk.mxu1 %vm84_vm0, %v273_v36 }
 0x167   :  { %778 = vmatpush3.xpose.msk.msra.mxu1 %vm84_vm0, %v273_v36  ;;  %v271_v37 = vpop.permute.xlu1 %270 }
 0x168   :  { %779 = vmatprep.subr.msk.mxu1 %vm84_vm0, %v271_v37 }
 0x169   :  { %v269_v38 = vpop.permute.xlu0 %268 }
 0x16b   :  { %780 = vmatpush3.xpose.msk.msra.mxu1 %vm84_vm0, %v271_v37  ;;  %v267_v39 = vpop.permute.xlu1 %266  ;;  %v592_v37 = vld [vmem:[#allocation5 + $0x8] sm:$0xff] }
 0x16c   :  { %781 = vmatprep.subr.msk.mxu1 %vm84_vm0, %v269_v38 }
 0x16d   :  { %v265_v40 = vpop.permute.xlu0 %264 }
 0x16f   :  { %782 = vmatpush3.xpose.msk.msra.mxu1 %vm84_vm0, %v269_v38  ;;  %v263_v41 = vpop.permute.xlu1 %262  ;;  %v591_v38 = vld [vmem:[#allocation5] sm:$0xff] }
 0x170   :  { %783 = vmatprep.subr.msk.mxu1 %vm84_vm0, %v267_v39 }
 0x171   :  { %v261_v42 = vpop.permute.xlu0 %260 }
 0x173   :  { %784 = vmatpush3.xpose.msk.msra.mxu1 %vm84_vm0, %v267_v39  ;;  %v259_v43 = vpop.permute.xlu1 %258 }
 0x174   :  { %785 = vmatprep.subr.msk.mxu1 %vm84_vm0, %v265_v40 }
 0x177   :  { %786 = vmatpush3.xpose.msk.msra.mxu1 %vm84_vm0, %v265_v40 }
 0x178   :  { %787 = vmatprep.subr.msk.mxu1 %vm84_vm0, %v263_v41 }
 0x17b   :  { %788 = vmatpush3.xpose.msk.msra.mxu1 %vm84_vm0, %v263_v41  ;;  %v723_v41 = vld [vmem:[%s1196_s4] ss:$0 sm:$0xff] }
 0x17c   :  { %789 = vmatprep.subr.msk.mxu1 %vm84_vm0, %v261_v42 }
 0x17f   :  { %790 = vmatpush3.xpose.msk.msra.mxu1 %vm84_vm0, %v261_v42 }
 0x180   :  { %791 = vmatprep.subr.msk.mxu1 %vm84_vm0, %v259_v43 }
 0x183   :  { %792 = vmatpush3.xpose.msk.msra.mxu1 %vm84_vm0, %v259_v43 }
 0x184   :  { %834 = vmatprep.subr.mxu1 %v594_v23 }
 0x186   :  { %794 = vmatmul.mubr.msk.f32.vlgmr.msra.gmra.mxu1 %vm84_vm0, %v167_v44 }
 0x187   :  { %835 = vmatpush3.msra.mxu1 %v594_v23 }
 0x188   :  { %836 = vmatprep.subr.mxu1 %v593_v24 }
 0x189   :  { %837 = vmatpush3.msra.mxu1 %v593_v24 }
 0x18a   :  { %838 = vmatprep.subr.mxu1 %v592_v37 }
 0x18b   :  { %839 = vmatpush3.msra.mxu1 %v592_v37 }
 0x18c   :  { %840 = vmatprep.subr.mxu1 %v591_v38 }
 0x18d   :  { %841 = vmatpush3.msra.mxu1 %v591_v38 }
 0x246   :  { %v795_v46 = vpop.f32.mrf.mxu1 }
 0x247   :  { %v368_v48 = vadd.f32 %v795_v46, %v249_v45 }
 0x248   :  { %v362_v49 = vpop.f32.mrf.mxu1 }
 0x249   :  { %v363_v50 = vadd.f32 %v362_v49, %v248_v47  ;;  %v375_v51 = vsel %vm371_vm1, %v368_v48, -inf }
 0x24a   :  { %376 = vmax.xlane.f32.xlu1 %v375_v51 }
 0x24b   :  { %v372_v52 = vsel %vm371_vm1, %v363_v50, -inf }
 0x24c   :  { %373 = vmax.xlane.f32.xlu0 %v372_v52 }
 0x25b   :  { %228 = vrot.lane.b32.xlu1 %v1048_v7, %s955_s5 }
 0x25f   :  { %224 = vrot.lane.b32.xlu1 %v1053_v8, %s955_s5 }
 0x262   :  { %230 = vrot.lane.b32.xlu0 %v1033_v4, %s955_s5 }
 0x263   :  { %220 = vrot.lane.b32.xlu1 %v1066_v11, %s955_s5 }
 0x266   :  { %226 = vrot.lane.b32.xlu0 %v1038_v5, %s955_s5 }
 0x267   :  { %216 = vrot.lane.b32.xlu1 %v1078_v13, %s955_s5 }
 0x26a   :  { %222 = vrot.lane.b32.xlu0 %v1060_v10, %s955_s5 }
 0x26e   :  { %218 = vrot.lane.b32.xlu0 %v1073_v12, %s955_s5 }
 0x2d3   :  { %v377_v61 = vpop.xlane.xlu1 %376 }
 0x2d4   :  { %v379_v62 = vsub.f32 %v368_v48, %v377_v61 }
 0x2d5   :  { %v374_v63 = vpop.xlane.xlu0 %373 }
 0x2d6   :  { %v378_v0 = vsub.f32 %v363_v50, %v374_v63  ;;  %v382_v1 = vmul.f32 1.442695, %v379_v62 }
 0x2d7   :  { %v229_v2 = vpop.permute.xlu1 %228 }
 0x2d8   :  { %v380_v3 = vmul.f32 1.442695, %v378_v0  ;;  %v246_v4 = vmul.f32 %v229_v2, %v1087_v22 }
 0x2d9   :  { %v231_v5 = vpop.permute.xlu0 %230 }
 0x2da   :  { %854 = vpow2.f32 %v380_v3  ;;  %v247_v6 = vmul.f32 %v231_v5, %v1085_v19  ;;  %497 = vrot.lane.b32.xlu1 %v246_v4, %s955_s5 }
 0x2db   :  { %856 = vpow2.f32 %v382_v1  ;;  %v225_v7 = vpop.permute.xlu1 %224 }
 0x2dc   :  { %v244_v8 = vmul.f32 %v225_v7, %v1087_v22  ;;  %499 = vrot.lane.b32.xlu0 %v247_v6, %s955_s5 }
 0x2dd   :  { %v227_v9 = vpop.permute.xlu0 %226 }
 0x2de   :  { %v245_v10 = vmul.f32 %v227_v9, %v1085_v19  ;;  %493 = vrot.lane.b32.xlu1 %v244_v8, %s955_s5 }
 0x2df   :  { %v221_v11 = vpop.permute.xlu1 %220 }
 0x2e0   :  { %v242_v12 = vmul.f32 %v221_v11, %v1087_v22  ;;  %495 = vrot.lane.b32.xlu0 %v245_v10, %s955_s5 }
 0x2e1   :  { %v223_v13 = vpop.permute.xlu0 %222 }
 0x2e2   :  { %v243_v14 = vmul.f32 %v223_v13, %v1085_v19  ;;  %489 = vrot.lane.b32.xlu1 %v242_v12, %s955_s5 }
 0x2e3   :  { %v217_v15 = vpop.permute.xlu1 %216 }
 0x2e4   :  { %v240_v16 = vmul.f32 %v217_v15, %v1087_v22  ;;  %491 = vrot.lane.b32.xlu0 %v243_v14, %s955_s5 }
 0x2e5   :  { %v219_v17 = vpop.permute.xlu0 %218 }
 0x2e6   :  { %v241_v18 = vmul.f32 %v219_v17, %v1085_v19  ;;  %485 = vrot.lane.b32.xlu1 %v240_v16, %s955_s5 }
 0x2e7   :  { %v855_v20 = vpop.eup %854 }
 0x2e8   :  { %v857_v21 = vpop.eup %856  ;;  %812 = vmatprep.mubr.msk.f32.mxu0 %vm371_vm1, %v855_v20  ;;  %487 = vrot.lane.b32.xlu0 %v241_v18, %s955_s5 }
 0x2e9   :  { %813 = vmatmul.mubr.msk.f32.vlgmr.msra.gmra.mxu0 %vm371_vm1, %v857_v21 }
 0x34c   :  { %v498_v22 = vpop.permute.xlu1 %497 }
 0x34e   :  { %v500_v25 = vpop.permute.xlu0 %499 }
 0x34f   :  { %815 = vmatprep.subr.mxu0 %v500_v25 }
 0x350   :  { %v494_v19 = vpop.permute.xlu1 %493  ;;  %816 = vmatpush3.msra.mxu0 %v500_v25 }
 0x351   :  { %817 = vmatprep.subr.mxu0 %v498_v22 }
 0x352   :  { %818 = vmatpush3.msra.mxu0 %v498_v22  ;;  %v496_v26 = vpop.permute.xlu0 %495 }
 0x353   :  { %819 = vmatprep.subr.mxu0 %v496_v26 }
 0x354   :  { %820 = vmatpush3.msra.mxu0 %v496_v26  ;;  %v490_v27 = vpop.permute.xlu1 %489 }
 0x355   :  { %821 = vmatprep.subr.mxu0 %v494_v19 }
 0x356   :  { %822 = vmatpush3.msra.mxu0 %v494_v19  ;;  %v492_v28 = vpop.permute.xlu0 %491 }
 0x357   :  { %823 = vmatprep.subr.mxu0 %v492_v28 }
 0x358   :  { %824 = vmatpush3.msra.mxu0 %v492_v28  ;;  %v486_v30 = vpop.permute.xlu1 %485 }
 0x359   :  { %825 = vmatprep.subr.mxu0 %v490_v27 }
 0x35a   :  { %826 = vmatpush3.msra.mxu0 %v490_v27  ;;  %v488_v29 = vpop.permute.xlu0 %487 }
 0x35b   :  { %827 = vmatprep.subr.mxu0 %v488_v29 }
 0x35c   :  { %828 = vmatpush3.msra.mxu0 %v488_v29 }
 0x35d   :  { %829 = vmatprep.subr.mxu0 %v486_v30 }
 0x35e   :  { %830 = vmatpush3.msra.mxu0 %v486_v30 }
 0x3a9   :  { %v814_v31 = vpop.f32.mrf.mxu0 }
 0x3aa   :  { %858 = vrcp.f32 %v814_v31 }
 0x3ab   :  { %v464_v32 = vpop.f32.mrf.mxu0 }
 0x3ac   :  { %860 = vrcp.f32 %v464_v32 }
 0x3b7   :  { %v859_v33 = vpop.eup %858 }
 0x3b8   :  { %v476_v36 = vmul.f32 %v859_v33, %v857_v21 }
 0x3b9   :  { %v861_v34 = vpop.eup %860 }
 0x3ba   :  { %v475_v35 = vmul.f32 %v861_v34, %v855_v20 }
 0x3bc   :  { %831 = vmatprep.mubr.msk.f32.mxu0 %vm371_vm1, %v475_v35 }
 0x3bd   :  { %832 = vmatmul.mubr.msk.f32.vlgmr.msra.gmra.mxu0 %vm371_vm1, %v476_v36 }
 0x47d   :  { %v833_v39 = vpop.f32.mrf.mxu0 }
 0x47f   :  { %v581_v40 = vpop.f32.mrf.mxu0 }
 0x480   :  { %842 = vmatprep.mubr.msk.f32.mxu1 %vm84_vm0, %v581_v40 }
 0x481   :  { %843 = vmatmul.mubr.msk.f32.vlgmr.msra.gmra.mxu1 %vm84_vm0, %v833_v39 }
 0x541   :  { %v844_v42 = vpop.f32.mrf.mxu1 }
 0x542   :  { %v683_v43 = vadd.f32 %v844_v42, %v723_v41 }
 0x543   :  { %v667_v44 = vpop.f32.mrf.mxu1 }
 0x544   :  { %685 = vst.msk [vmem:[#allocation8 + $0x8] sm:$0xff] %vm84_vm0, %v683_v43  ;;  %v682_v45 = vadd.f32 %v723_v41, %v667_v44 }
 0x546   :  { %684 = vst.msk [vmem:[#allocation8] sm:$0xff] %vm84_vm0, %v682_v45 }
 0x547   :  { %933 = shalt.err (!%p930_p5)
}
 0x548   :  { %697 = dma.vmem_to_hbm [thread:$0]  %s692_s19, 256, %s1200_s8, [#allocation4], %s950_s10, %s950_s10, %s951_s11  }
 0x549   :  { %946 = dma.done.wait [#allocation4], 256  }
 0x54a   :  { %947 = vsyncadd [#allocation4], 4294967040 }
 0x54b   :  { %701 = vsyncpa [#allocation3], 1 }
 0x54c   :  { %702 = vsyncpa [#allocation6], 1 }
 0x54d   :  { %703 = vsyncpa [#allocation4], 1 }

</bundles_post_ra>
